<compile_context>
chip_gen: v5e
topology: v5e:2x2
jax: 0.10.0
libtpu: 0.0.40
codegen_flags: <defaults>
</compile_context>

<pallas_src>
import jax
import jax.numpy as jnp
import numpy as np
from jax.experimental import pallas as pl
from jax.experimental.pallas import tpu as pltpu


# ---------------------------------------------------------------------------
# Primary path: zero-traffic aliased pass-through.
# ---------------------------------------------------------------------------
def _noop_kernel(x_ref, o_ref):
    # Input and output buffers are aliased (input_output_aliases={0: 0}) and
    # stay in HBM (pl.ANY), so there is nothing to move: empty body.
    pass


def _alias_identity(x):
    return pl.pallas_call(
        _noop_kernel,
        out_shape=jax.ShapeDtypeStruct(x.shape, x.dtype),
        in_specs=[pl.BlockSpec(memory_space=pl.ANY)],
        out_specs=pl.BlockSpec(memory_space=pl.ANY),
        input_output_aliases={0: 0},
        cost_estimate=pl.CostEstimate(flops=0, transcendentals=0, bytes_accessed=0),
    )(x)


# ---------------------------------------------------------------------------
# Fallback path: tiled, double-buffered copy (improved sizing).
# ---------------------------------------------------------------------------
_SUBLANE = {1: 32, 2: 16, 4: 8, 8: 8}  # rows per vreg sublane pack by itemsize


def _copy_kernel(x_ref, o_ref):
    o_ref[...] = x_ref[...]


def _lane_dense_2d(x):
    """View x as (rows, cols) with cols a multiple of 128 when possible."""
    total = int(np.prod(x.shape, dtype=np.int64))
    last = x.shape[-1] if x.ndim >= 1 else 1
    if x.ndim >= 2 and last >= 128 and last % 128 == 0:
        return x.reshape(total // last, last)
    for c in (1024, 512, 256, 128):
        if total % c == 0:
            return x.reshape(total // c, c)
    # Ragged element count: keep the original last dim (masked edge lanes,
    # still correct) -- only hit for odd shapes.
    if x.ndim >= 2:
        return x.reshape(total // last, last)
    return x.reshape(1, total)


def _pick_tiles(rows, cols, itemsize, target_block_bytes):
    """(tile_rows, tile_cols) obeying (8,128)/full-dim rules and byte budget."""
    sub = _SUBLANE.get(itemsize, 8)
    row_bytes = max(cols * itemsize, 1)

    if row_bytes > target_block_bytes and cols > 128 and cols % 128 == 0:
        # Very wide rows: tile the lane axis too (multiple of 128).
        tile_cols = max(128, (target_block_bytes // (sub * itemsize)) // 128 * 128)
        tile_cols = min(tile_cols, cols)
        tile_rows = min(rows, sub)
        return tile_rows, tile_cols

    # Normal case: full lane width, tile rows only.
    if rows <= sub:
        return rows, cols
    tile_rows = (target_block_bytes // row_bytes) // sub * sub
    tile_rows = max(sub, tile_rows)
    tile_rows = min(tile_rows, rows)
    return tile_rows, cols


def _copy_identity(x, *, target_block_bytes=4 << 20):
    orig_shape = x.shape
    x2 = _lane_dense_2d(x)
    rows, cols = x2.shape
    itemsize = jnp.dtype(x2.dtype).itemsize

    tile_rows, tile_cols = _pick_tiles(rows, cols, itemsize, target_block_bytes)
    grid = (pl.cdiv(rows, tile_rows), pl.cdiv(cols, tile_cols))

    block_bytes = tile_rows * tile_cols * itemsize
    # in + out, double-buffered (4x block) plus compiler slack; capped so it
    # always fits v7x's 64 MiB physical VMEM.
    vmem_limit = int(min(64 << 20, max(32 << 20, 5 * block_bytes)))

    out2 = pl.pallas_call(
        _copy_kernel,
        out_shape=jax.ShapeDtypeStruct((rows, cols), x2.dtype),
        grid=grid,
        in_specs=[pl.BlockSpec((tile_rows, tile_cols), lambda i, j: (i, j))],
        out_specs=pl.BlockSpec((tile_rows, tile_cols), lambda i, j: (i, j)),
        compiler_params=pltpu.CompilerParams(
            dimension_semantics=("parallel", "parallel"),
            vmem_limit_bytes=vmem_limit,
        ),
        cost_estimate=pl.CostEstimate(
            flops=0,
            transcendentals=0,
            bytes_accessed=2 * rows * cols * itemsize,
        ),
    )(x2)
    return out2.reshape(orig_shape)


# ---------------------------------------------------------------------------
# Wrapper
# ---------------------------------------------------------------------------
def identity(x):
    """Pallas forward of nn.Identity: returns x (same values, shape, dtype)."""
    x = jnp.asarray(x)
    if x.ndim == 0 or x.size == 0:
        # TODO(synk): 0-d / empty inputs have no tileable layout; pure pass-through.
        return x
    try:
        return _alias_identity(x)
    except Exception:
        # If the zero-traffic aliased no-op fails to lower on this backend,
        # fall back to the tiled, double-buffered copy.
        return _copy_identity(x)


if __name__ == "__main__":
    key = jax.random.PRNGKey(0)
    k1, k2, k3, k4, k5, k6 = jax.random.split(key, 6)

    def check(name, y, x):
        y = jax.block_until_ready(y)
        same = (
            y.shape == x.shape
            and y.dtype == x.dtype
            and np.array_equal(
                np.asarray(y.astype(jnp.float32)),
                np.asarray(x.astype(jnp.float32)),
            )
        )
        if not same:
            print(f"mismatch for {name}: shape={y.shape} dtype={y.dtype}")
        return same

    ok = True

    # Primary (aliased pass-through) path on shapes the module might see.
    primary_cases = {
        "x_f32": jax.random.normal(k1, (256, 128), jnp.float32),            # [N, hidden]
        "x_bf16": jax.random.normal(k2, (4, 64, 128), jnp.float32).astype(jnp.bfloat16),
        "x_ragged": jax.random.normal(k3, (50, 96), jnp.float32),
        "x_1d": jax.random.normal(k4, (4096,), jnp.float32),
    }
    for name, x in primary_cases.items():
        ok &= check(name, identity(x), x)

    # Explicitly exercise the tiled-copy fallback so it is also validated:
    #  - multi-step grid with a partial edge row tile,
    #  - wide-row case that triggers column tiling,
    #  - bf16 sublane-packed tiles.
    copy_cases = {
        "copy_partial_tiles": (
            jax.random.normal(k5, (300, 128), jnp.float32),
            {"target_block_bytes": 16384},
        ),
        "copy_wide_rows": (
            jax.random.normal(k6, (8, 2048), jnp.float32),
            {"target_block_bytes": 4096},
        ),
        "copy_bf16": (primary_cases["x_bf16"], {}),
    }
    for name, (x, kwargs) in copy_cases.items():
        ok &= check(name, _copy_identity(x, **kwargs), x)

    if ok:
        print("KERNEL_OK")
</pallas_src>

<mosaic_0001>
module attributes {stable_mosaic.version = 11 : i64} {
  func.func @_noop_kernel(%arg0: memref<256x128xf32, #tpu.memory_space<any>>, %arg1: memref<256x128xf32, #tpu.memory_space<any>>) attributes {dimension_semantics = [], scalar_prefetch = 0 : i64, scratch_operands = 0 : i64, tpu.core_type = #tpu.core_type<tc>} {
    return
  }
}

module attributes {stable_mosaic.version = 11 : i64} {
  func.func @_copy_kernel(%arg0: i32, %arg1: i32, %arg2: memref<256x128xf32, #tpu.memory_space<vmem>>, %arg3: memref<256x128xf32, #tpu.memory_space<vmem>>) attributes {dimension_semantics = [#tpu.dimension_semantics<parallel>, #tpu.dimension_semantics<parallel>], iteration_bounds = array<i64: 1, 1>, scalar_prefetch = 0 : i64, scratch_operands = 0 : i64, tpu.core_type = #tpu.core_type<tc>, window_params = [{transform_indices = @transform_0, window_bounds = array<i64: 256, 128>}, {transform_indices = @transform_1, window_bounds = array<i64: 256, 128>}]} {
    %c0 = arith.constant 0 : index
    %c0_0 = arith.constant 0 : index
    %0 = vector.load %arg2[%c0, %c0_0] : memref<256x128xf32, #tpu.memory_space<vmem>>, vector<256x128xf32>
    %c0_1 = arith.constant 0 : index
    %c0_2 = arith.constant 0 : index
    %1 = vector.load %arg3[%c0_1, %c0_2] : memref<256x128xf32, #tpu.memory_space<vmem>>, vector<256x128xf32>
    tpu.vector_store %arg3[%c0_1, %c0_2], %0 {strides = array<i32>} : memref<256x128xf32, #tpu.memory_space<vmem>>, vector<256x128xf32>,
    return
  }
  func.func @transform_0(%arg0: i32, %arg1: i32) -> (i32, i32) {
    %c0_i32 = arith.constant 0 : i32
    return %arg0, %arg1 : i32, i32
  }
  func.func @transform_1(%arg0: i32, %arg1: i32) -> (i32, i32) {
    %c0_i32 = arith.constant 0 : i32
    return %arg0, %arg1 : i32, i32
  }
}

</mosaic_0001>

<bundles_post_ra>
// kernel: tpu_custom_call.1
= control target key start
LH: loop header
LB: loop body
LE: loop exit
PB: predicated region body
PF: predicated region fallthrough
CT: control target
= control target key end

     0   :  { %s16_s0 = inlined_call_operand.hbm [shape: f32[256,128], index: 0, kind: input, shape index: {}, may-alias: {0,1}]   ;;  %s17_s1 = inlined_call_operand.hbm [shape: f32[256,128], index: 1, kind: output, shape index: {}, may-alias: {0,1}]  }

// kernel: tpu_custom_call.1
= control target key start
LH: loop header
LB: loop body
LE: loop exit
PB: predicated region body
PF: predicated region fallthrough
CT: control target
= control target key end

     0   :  { %6 = vsyncpa [#allocation3], 0  ;;  %s190_s0 = inlined_call_operand.hbm [shape: f32[256,128], index: 0, kind: input, shape index: {}]   ;;  %s191_s1 = inlined_call_operand.hbm [shape: f32[256,128], index: 1, kind: output, shape index: {}]  }
   0x1   :  { %7 = vsyncpa [#allocation4], 0  ;;  %s12_s8 = sshll.u32 %s190_s0, 4  ;;  %s164_s9 = smov [#allocation2]   ;;  %s13_s8 = int_to_ptr.hbm [resolvable:$true] %s12_s8 }
   0x2   :  { %s14_s10 = sshll.u32 %s164_s9, 4  ;;  %s165_s11 = smov 128   ;;  %s15_s10 = int_to_ptr.vmem [resolvable:$true] %s14_s10 }
   0x3   :  { %s166_s12 = smov 8  }
   0x4   :  { %20 = dma.hbm_to_vmem [thread:$0]  %s13_s8, 4096, %s15_s10, [#allocation3], %s165_s11, %s165_s11, %s166_s12  }
   0x5   :  { %160 = dma.done.wait [#allocation3], 4096  }
   0x6   :  { %161 = vsyncadd [#allocation3], 4294963200  ;;  %v25_v0 = vld [vmem:[#allocation2] sm:$0xff]  ;;  %v26_v1 = vld [vmem:[#allocation2 + $0x8] sm:$0xff]  ;;  %s167_s0 = smov [#allocation5]   ;;  %s95_s16 = sshll.u32 %s191_s1, 4  ;;  %s96_s16 = int_to_ptr.hbm [resolvable:$true] %s95_s16 }
   0x7   :  { %v27_v2 = vld [vmem:[#allocation2 + $0x10] sm:$0xff]  ;;  %57 = vst [vmem:[#allocation5] sm:$0xff] %v25_v0  ;;  %v28_v3 = vld [vmem:[#allocation2 + $0x18] sm:$0xff]  ;;  %v29_v4 = vld [vmem:[#allocation2 + $0x20] sm:$0xff]  ;;  %s93_s13 = sshll.u32 %s167_s0, 4  ;;  %s94_s13 = int_to_ptr.vmem [resolvable:$true] %s93_s13 }
   0x8   :  { %58 = vst [vmem:[#allocation5 + $0x8] sm:$0xff] %v26_v1  ;;  %v30_v5 = vld [vmem:[#allocation2 + $0x28] sm:$0xff]  ;;  %v31_v6 = vld [vmem:[#allocation2 + $0x30] sm:$0xff]  ;;  %v32_v7 = vld [vmem:[#allocation2 + $0x38] sm:$0xff] }
   0x9   :  { %59 = vst [vmem:[#allocation5 + $0x10] sm:$0xff] %v27_v2  ;;  %v33_v8 = vld [vmem:[#allocation2 + $0x40] sm:$0xff]  ;;  %v34_v9 = vld [vmem:[#allocation2 + $0x48] sm:$0xff]  ;;  %v35_v10 = vld [vmem:[#allocation2 + $0x50] sm:$0xff] }
   0xa   :  { %60 = vst [vmem:[#allocation5 + $0x18] sm:$0xff] %v28_v3  ;;  %v36_v11 = vld [vmem:[#allocation2 + $0x58] sm:$0xff]  ;;  %v37_v12 = vld [vmem:[#allocation2 + $0x60] sm:$0xff]  ;;  %v38_v13 = vld [vmem:[#allocation2 + $0x68] sm:$0xff] }
   0xb   :  { %61 = vst [vmem:[#allocation5 + $0x20] sm:$0xff] %v29_v4  ;;  %v39_v14 = vld [vmem:[#allocation2 + $0x70] sm:$0xff]  ;;  %v40_v15 = vld [vmem:[#allocation2 + $0x78] sm:$0xff]  ;;  %v41_v16 = vld [vmem:[#allocation2 + $0x80] sm:$0xff] }
   0xc   :  { %62 = vst [vmem:[#allocation5 + $0x28] sm:$0xff] %v30_v5  ;;  %v42_v17 = vld [vmem:[#allocation2 + $0x88] sm:$0xff]  ;;  %v43_v18 = vld [vmem:[#allocation2 + $0x90] sm:$0xff]  ;;  %v44_v19 = vld [vmem:[#allocation2 + $0x98] sm:$0xff] }
   0xd   :  { %63 = vst [vmem:[#allocation5 + $0x30] sm:$0xff] %v31_v6  ;;  %v45_v20 = vld [vmem:[#allocation2 + $0xa0] sm:$0xff]  ;;  %v46_v21 = vld [vmem:[#allocation2 + $0xa8] sm:$0xff]  ;;  %v47_v22 = vld [vmem:[#allocation2 + $0xb0] sm:$0xff] }
   0xe   :  { %64 = vst [vmem:[#allocation5 + $0x38] sm:$0xff] %v32_v7  ;;  %v48_v23 = vld [vmem:[#allocation2 + $0xb8] sm:$0xff]  ;;  %v49_v24 = vld [vmem:[#allocation2 + $0xc0] sm:$0xff]  ;;  %v50_v25 = vld [vmem:[#allocation2 + $0xc8] sm:$0xff] }
   0xf   :  { %65 = vst [vmem:[#allocation5 + $0x40] sm:$0xff] %v33_v8  ;;  %v51_v26 = vld [vmem:[#allocation2 + $0xd0] sm:$0xff]  ;;  %v52_v27 = vld [vmem:[#allocation2 + $0xd8] sm:$0xff]  ;;  %v53_v28 = vld [vmem:[#allocation2 + $0xe0] sm:$0xff] }
  0x10   :  { %66 = vst [vmem:[#allocation5 + $0x48] sm:$0xff] %v34_v9  ;;  %v54_v29 = vld [vmem:[#allocation2 + $0xe8] sm:$0xff]  ;;  %v55_v30 = vld [vmem:[#allocation2 + $0xf0] sm:$0xff]  ;;  %v56_v31 = vld [vmem:[#allocation2 + $0xf8] sm:$0xff] }
  0x11   :  { %67 = vst [vmem:[#allocation5 + $0x50] sm:$0xff] %v35_v10 }
  0x12   :  { %68 = vst [vmem:[#allocation5 + $0x58] sm:$0xff] %v36_v11 }
  0x13   :  { %69 = vst [vmem:[#allocation5 + $0x60] sm:$0xff] %v37_v12 }
  0x14   :  { %70 = vst [vmem:[#allocation5 + $0x68] sm:$0xff] %v38_v13 }
  0x15   :  { %71 = vst [vmem:[#allocation5 + $0x70] sm:$0xff] %v39_v14 }
  0x16   :  { %72 = vst [vmem:[#allocation5 + $0x78] sm:$0xff] %v40_v15 }
  0x17   :  { %73 = vst [vmem:[#allocation5 + $0x80] sm:$0xff] %v41_v16 }
  0x18   :  { %74 = vst [vmem:[#allocation5 + $0x88] sm:$0xff] %v42_v17 }
  0x19   :  { %75 = vst [vmem:[#allocation5 + $0x90] sm:$0xff] %v43_v18 }
  0x1a   :  { %76 = vst [vmem:[#allocation5 + $0x98] sm:$0xff] %v44_v19 }
  0x1b   :  { %77 = vst [vmem:[#allocation5 + $0xa0] sm:$0xff] %v45_v20 }
  0x1c   :  { %78 = vst [vmem:[#allocation5 + $0xa8] sm:$0xff] %v46_v21 }
  0x1d   :  { %79 = vst [vmem:[#allocation5 + $0xb0] sm:$0xff] %v47_v22 }
  0x1e   :  { %80 = vst [vmem:[#allocation5 + $0xb8] sm:$0xff] %v48_v23 }
  0x1f   :  { %81 = vst [vmem:[#allocation5 + $0xc0] sm:$0xff] %v49_v24 }
  0x20   :  { %82 = vst [vmem:[#allocation5 + $0xc8] sm:$0xff] %v50_v25 }
  0x21   :  { %83 = vst [vmem:[#allocation5 + $0xd0] sm:$0xff] %v51_v26 }
  0x22   :  { %84 = vst [vmem:[#allocation5 + $0xd8] sm:$0xff] %v52_v27 }
  0x23   :  { %85 = vst [vmem:[#allocation5 + $0xe0] sm:$0xff] %v53_v28 }
  0x24   :  { %86 = vst [vmem:[#allocation5 + $0xe8] sm:$0xff] %v54_v29 }
  0x25   :  { %87 = vst [vmem:[#allocation5 + $0xf0] sm:$0xff] %v55_v30 }
  0x26   :  { %88 = vst [vmem:[#allocation5 + $0xf8] sm:$0xff] %v56_v31 }
  0x27   :  { %101 = dma.vmem_to_hbm [thread:$0]  %s94_s13, 4096, %s96_s16, [#allocation4], %s165_s11, %s165_s11, %s166_s12  }
  0x28   :  { %162 = dma.done.wait [#allocation4], 4096  }
  0x29   :  { %163 = vsyncadd [#allocation4], 4294963200 }
  0x2a   :  { %106 = vsyncpa [#allocation3], 1 }
  0x2b   :  { %107 = vsyncpa [#allocation4], 1 }

</bundles_post_ra>
